<compile_context>
chip_gen: v5e
topology: v5e:2x2
jax: 0.10.0
libtpu: 0.0.40
codegen_flags: <defaults>
</compile_context>

<pallas_src>
import functools

import jax
import jax.numpy as jnp
from jax import lax
from jax.experimental import pallas as pl
from jax.experimental.pallas import tpu as pltpu


# ----------------------------------------------------------------------------
# In-kernel math helpers
# ----------------------------------------------------------------------------

_SQRT_HALF = 0.7071067811865476


def _erf(x):
    # Abramowitz & Stegun 7.1.26 (max abs err ~1.5e-7).  Built only from ops
    # with guaranteed Mosaic lowerings (abs/exp/mul/add/where), so we do not
    # rely on an erf primitive inside the kernel.
    a1, a2, a3, a4, a5 = (0.254829592, -0.284496736, 1.421413741,
                          -1.453152027, 1.061405429)
    p = 0.3275911
    ax = jnp.abs(x)
    t = 1.0 / (1.0 + p * ax)
    poly = ((((a5 * t + a4) * t + a3) * t + a2) * t + a1) * t
    y = 1.0 - poly * jnp.exp(-ax * ax)
    return jnp.where(x >= 0, y, -y)


def _gelu_exact(x):
    # nn.GELU() (erf form), matching torch's default.
    return 0.5 * x * (1.0 + _erf(x * _SQRT_HALF))


# ----------------------------------------------------------------------------
# Kernel 1: masked-sum pooling (HBM-bound hot loop)
# ----------------------------------------------------------------------------

def _masked_sum_kernel(hidden_ref, mask_ref, out_ref):
    """Single pass over the whole sequence (ts == S): no scratch, no branches."""
    m = mask_ref[...].astype(hidden_ref.dtype)                 # (TB, 1, S) bf16
    out_ref[...] = lax.dot_general(                            # (TB, 1, H) f32
        m, hidden_ref[...],
        dimension_numbers=(((2,), (1,)), ((0,), (0,))),
        preferred_element_type=jnp.float32)


def _masked_sum_accum_kernel(hidden_ref, mask_ref, out_ref, acc_ref):
    """Sequence split across grid axis 1; f32 accumulator resident in VMEM."""
    s = pl.program_id(1)

    @pl.when(s == 0)
    def _init():
        acc_ref[...] = jnp.zeros_like(acc_ref)

    m = mask_ref[...].astype(hidden_ref.dtype)                 # (TB, 1, TS) bf16
    acc_ref[...] += lax.dot_general(                           # (TB, 1, H) f32
        m, hidden_ref[...],
        dimension_numbers=(((2,), (1,)), ((0,), (0,))),
        preferred_element_type=jnp.float32)

    @pl.when(s == pl.num_programs(1) - 1)
    def _finalize():
        out_ref[...] = acc_ref[...]


# ----------------------------------------------------------------------------
# Kernel 2: tiny classifier-head epilogue (once per batch, negligible compute)
# ----------------------------------------------------------------------------

def _classifier_head_kernel(sum_ref, inv_len_ref, w1_ref, b1_ref, w2_ref,
                            b2_ref, out_ref):
    pooled = sum_ref[...] * inv_len_ref[...]                   # masked mean (B, H)
    pooled = jnp.clip(pooled, -100.0, 100.0)                   # torch.clamp(-100, 100)
    x = jnp.dot(pooled, w1_ref[...],
                preferred_element_type=jnp.float32) + b1_ref[...]
    x = _gelu_exact(x)                                         # nn.GELU()
    # TODO(synk): Dropout(0.3) is training-only; identity at inference.
    # Linear(H/2, 1) as a VPU multiply + lane reduction (no N=1 MXU matmul).
    logits = jnp.sum(x * w2_ref[...], axis=-1, keepdims=True) + b2_ref[...]
    out_ref[...] = jax.nn.sigmoid(logits)                      # (B, 1)


# ----------------------------------------------------------------------------
# Generation-aware tile / VMEM sizing
# ----------------------------------------------------------------------------

def _vmem_capacity_bytes():
    try:
        cap = int(getattr(pltpu.get_tpu_info(), "vmem_capacity_bytes", 0))
        if cap > 0:
            return cap
    except Exception:
        pass
    return 64 * 1024 * 1024       # v7x-safe fallback (smallest per-TC VMEM)


def _choose_tiles(B, S, H, itemsize):
    """Pick (tb, ts) so one pipelined hidden buffer stays <= ~VMEM/4."""
    vmem_cap = _vmem_capacity_bytes()
    per_buffer_budget = max(vmem_cap // 4, 2 * 1024 * 1024)

    def hidden_block_bytes(tb, ts):
        return tb * ts * H * itemsize

    # Sequence tile: prefer the whole sequence (single pass, no accumulator).
    if hidden_block_bytes(1, S) <= per_buffer_budget:
        ts = S
    else:
        ts = 0
        for cand in range(128, S + 1, 128):
            if S % cand == 0 and hidden_block_bytes(1, cand) <= per_buffer_budget:
                ts = cand
        if ts == 0:
            raise ValueError("sequence/hidden dims too large for a single-row tile")

    # Batch tile: largest divisor of B that fits; keep >= 2 batch tiles so
    # v7x's two TensorCores (parallel axis) both get work.
    tb = 1
    for cand in range(2, B + 1):
        if (B % cand == 0 and B // cand >= 2
                and hidden_block_bytes(cand, ts) <= per_buffer_budget):
            tb = cand
    return tb, ts, vmem_cap


# ----------------------------------------------------------------------------
# Forward
# ----------------------------------------------------------------------------

@functools.partial(jax.jit, static_argnames=("tb", "ts", "vmem_limit"))
def _forward(last_hidden, attention_mask, w1, b1, w2, b2, *, tb, ts, vmem_limit):
    B, S, H = last_hidden.shape

    # Mask stays bf16 on the wire (halves its HBM read) and is pre-shaped
    # (B, 1, S) so the in-kernel pooling is a rank-3 batched MXU matmul with
    # no in-kernel reshapes.
    mask3 = attention_mask.astype(jnp.bfloat16).reshape(B, 1, S)
    # Token lengths once in XLA; only the tiny epilogue consumes them.
    lens = jnp.sum(attention_mask.astype(jnp.float32), axis=-1, keepdims=True)
    inv_len = 1.0 / jnp.maximum(lens, 1e-6)                    # (B, 1)

    hidden_block = (tb, ts, H)
    mask_block = (tb, 1, ts)
    out_block = (tb, 1, H)

    if ts == S:
        pooled_sums = pl.pallas_call(
            _masked_sum_kernel,
            out_shape=jax.ShapeDtypeStruct((B, 1, H), jnp.float32),
            grid_spec=pltpu.PrefetchScalarGridSpec(
                num_scalar_prefetch=0,
                grid=(B // tb,),
                in_specs=[
                    pl.BlockSpec(hidden_block, lambda b: (b, 0, 0)),
                    pl.BlockSpec(mask_block, lambda b: (b, 0, 0)),
                ],
                out_specs=pl.BlockSpec(out_block, lambda b: (b, 0, 0)),
            ),
            compiler_params=pltpu.CompilerParams(
                dimension_semantics=("parallel",),
                vmem_limit_bytes=vmem_limit),
        )(last_hidden, mask3)
    else:
        pooled_sums = pl.pallas_call(
            _masked_sum_accum_kernel,
            out_shape=jax.ShapeDtypeStruct((B, 1, H), jnp.float32),
            grid_spec=pltpu.PrefetchScalarGridSpec(
                num_scalar_prefetch=0,
                grid=(B // tb, S // ts),                       # seq (reduction) last
                in_specs=[
                    pl.BlockSpec(hidden_block, lambda b, s: (b, s, 0)),
                    pl.BlockSpec(mask_block, lambda b, s: (b, 0, s)),
                ],
                out_specs=pl.BlockSpec(out_block, lambda b, s: (b, 0, 0)),
                scratch_shapes=[pltpu.VMEM((tb, 1, H), jnp.float32)],
            ),
            compiler_params=pltpu.CompilerParams(
                dimension_semantics=("parallel", "arbitrary"),
                vmem_limit_bytes=vmem_limit),
        )(last_hidden, mask3)

    # Tiny epilogue in its own whole-array pallas_call: keeps the classifier
    # weights out of the bandwidth-critical pooling pipeline's VMEM budget.
    w2_row = jnp.transpose(w2)                                 # (1, H2) lane-dense
    probs = pl.pallas_call(
        _classifier_head_kernel,
        out_shape=jax.ShapeDtypeStruct((B, 1), jnp.float32),
    )(pooled_sums.reshape(B, H), inv_len, w1, b1, w2_row, b2)
    return probs[:, 0]                                         # squeeze(-1)


def polylm_classifier_head(last_hidden, attention_mask, w1, b1, w2, b2,
                           *, tb=None, ts=None):
    """last_hidden: (B, S, H) bf16/f32, attention_mask: (B, S) {0,1}.
    w1: (H, H2), b1: (1, H2), w2: (H2, 1), b2: (1, 1)  (transposes of the
    PyTorch nn.Linear (out, in) weights).  Returns probabilities (B,)."""
    B, S, H = last_hidden.shape
    auto_tb, auto_ts, vmem_cap = _choose_tiles(B, S, H,
                                               last_hidden.dtype.itemsize)
    tb = auto_tb if tb is None else tb
    ts = auto_ts if ts is None else ts
    assert B % tb == 0 and S % ts == 0
    vmem_limit = int(min(vmem_cap * 3 // 4, 112 * 1024 * 1024))
    return _forward(last_hidden, attention_mask, w1, b1, w2, b2,
                    tb=tb, ts=ts, vmem_limit=vmem_limit)


# ----------------------------------------------------------------------------
# Pure-JAX reference
# ----------------------------------------------------------------------------

def reference_head(last_hidden, attention_mask, w1, b1, w2, b2):
    h = last_hidden.astype(jnp.float32)
    m = attention_mask.astype(jnp.float32)[:, :, None]
    sum_hidden = jnp.sum(h * m, axis=1)
    lens = jnp.maximum(jnp.sum(m, axis=1), 1e-6)
    pooled = jnp.clip(sum_hidden / lens, -100.0, 100.0)
    x = jax.nn.gelu(pooled @ w1 + b1[0], approximate=False)
    logits = (x @ w2 + b2[0])[:, 0]
    return jax.nn.sigmoid(logits)


if __name__ == "__main__":
    # Small shapes consistent with the module's forward:
    # batch B=16, seq S=256, hidden H=128, classifier hidden H//2=64.
    B, S, H = 16, 256, 128
    H2 = H // 2

    key = jax.random.PRNGKey(0)
    k_h, k_w1, k_b1, k_w2, k_b2 = jax.random.split(key, 5)

    # Synthetic LM final hidden states (stands in for outputs.hidden_states[-1]),
    # kept bf16 like the fp16 LM output so HBM traffic is halved.
    last_hidden = jax.random.normal(k_h, (B, S, H), dtype=jnp.float32)
    last_hidden = last_hidden.astype(jnp.bfloat16)

    # Variable-length attention mask (padding at the end), bf16 on the wire.
    lengths = 1 + (jnp.arange(B, dtype=jnp.int32) * 37) % S
    attention_mask = (jnp.arange(S)[None, :] < lengths[:, None]).astype(jnp.bfloat16)

    # Deterministic classifier parameters (nn.Linear transposes: (in, out)).
    w1 = jax.random.normal(k_w1, (H, H2), dtype=jnp.float32) * 0.05
    b1 = jax.random.normal(k_b1, (1, H2), dtype=jnp.float32) * 0.05
    w2 = jax.random.normal(k_w2, (H2, 1), dtype=jnp.float32) * 0.05
    b2 = jax.random.normal(k_b2, (1, 1), dtype=jnp.float32) * 0.05

    ref = reference_head(last_hidden, attention_mask, w1, b1, w2, b2)

    # 1) Auto-tiled path (full-S single-pass pooling for these shapes).
    probs = polylm_classifier_head(last_hidden, attention_mask, w1, b1, w2, b2)
    probs = jax.block_until_ready(probs)
    assert probs.shape == (B,)
    assert jnp.all(jnp.isfinite(probs))
    assert jnp.all((probs >= 0) & (probs <= 1))
    assert jnp.allclose(probs, ref, atol=5e-5, rtol=5e-4), (
        f"single-pass max abs diff {jnp.max(jnp.abs(probs - ref))}")

    # 2) Forced multi-seq-tile path (exercises the f32 VMEM accumulator).
    probs_acc = polylm_classifier_head(last_hidden, attention_mask,
                                       w1, b1, w2, b2, tb=8, ts=128)
    probs_acc = jax.block_until_ready(probs_acc)
    assert jnp.allclose(probs_acc, ref, atol=5e-5, rtol=5e-4), (
        f"accumulator max abs diff {jnp.max(jnp.abs(probs_acc - ref))}")

    print("KERNEL_OK")
</pallas_src>

<mosaic_0001>
module attributes {stable_mosaic.version = 11 : i64} {
  func.func @_masked_sum_kernel(%arg0: i32, %arg1: memref<8x256x128xbf16, #tpu.memory_space<vmem>>, %arg2: memref<8x1x256xbf16, #tpu.memory_space<vmem>>, %arg3: memref<8x1x128xf32, #tpu.memory_space<vmem>>) attributes {dimension_semantics = [#tpu.dimension_semantics<parallel>], iteration_bounds = array<i64: 2>, scalar_prefetch = 0 : i64, scratch_operands = 0 : i64, tpu.core_type = #tpu.core_type<tc>, window_params = [{transform_indices = @transform_0, window_bounds = array<i64: 8, 256, 128>}, {transform_indices = @transform_1, window_bounds = array<i64: 8, 1, 256>}, {transform_indices = @transform_2, window_bounds = array<i64: 8, 1, 128>}]} {
    %c0 = arith.constant 0 : index
    %c0_0 = arith.constant 0 : index
    %c0_1 = arith.constant 0 : index
    %0 = vector.load %arg2[%c0, %c0_0, %c0_1] : memref<8x1x256xbf16, #tpu.memory_space<vmem>>, vector<8x1x256xbf16>
    %c0_2 = arith.constant 0 : index
    %c0_3 = arith.constant 0 : index
    %c0_4 = arith.constant 0 : index
    %1 = vector.load %arg1[%c0_2, %c0_3, %c0_4] : memref<8x256x128xbf16, #tpu.memory_space<vmem>>, vector<8x256x128xbf16>
    %cst = arith.constant dense<0.000000e+00> : vector<8x1x128xf32>
    %2 = tpu.matmul %0, %1, %cst {dimension_numbers = #tpu.dot_dimension_numbers<[2], [1], [1], [2], [0, 0, 0, 1, 1, 2], [0], [0]>} : vector<8x1x256xbf16>, vector<8x256x128xbf16>, vector<8x1x128xf32> -> vector<8x1x128xf32>
    %c0_5 = arith.constant 0 : index
    %c0_6 = arith.constant 0 : index
    %c0_7 = arith.constant 0 : index
    %3 = vector.load %arg3[%c0_5, %c0_6, %c0_7] : memref<8x1x128xf32, #tpu.memory_space<vmem>>, vector<8x1x128xf32>
    tpu.vector_store %arg3[%c0_5, %c0_6, %c0_7], %2 {strides = array<i32>} : memref<8x1x128xf32, #tpu.memory_space<vmem>>, vector<8x1x128xf32>,
    return
  }
  func.func @transform_0(%arg0: i32) -> (i32, i32, i32) {
    %c0_i32 = arith.constant 0 : i32
    %c0_i32_0 = arith.constant 0 : i32
    %c0_i32_1 = arith.constant 0 : i32
    return %arg0, %c0_i32, %c0_i32_0 : i32, i32, i32
  }
  func.func @transform_1(%arg0: i32) -> (i32, i32, i32) {
    %c0_i32 = arith.constant 0 : i32
    %c0_i32_0 = arith.constant 0 : i32
    %c0_i32_1 = arith.constant 0 : i32
    return %arg0, %c0_i32, %c0_i32_0 : i32, i32, i32
  }
  func.func @transform_2(%arg0: i32) -> (i32, i32, i32) {
    %c0_i32 = arith.constant 0 : i32
    %c0_i32_0 = arith.constant 0 : i32
    %c0_i32_1 = arith.constant 0 : i32
    return %arg0, %c0_i32, %c0_i32_0 : i32, i32, i32
  }
}

module attributes {stable_mosaic.version = 11 : i64} {
  func.func @_classifier_head_kernel(%arg0: memref<16x128xf32, #tpu.memory_space<vmem>>, %arg1: memref<16x1xf32, #tpu.memory_space<vmem>>, %arg2: memref<128x64xf32, #tpu.memory_space<vmem>>, %arg3: memref<1x64xf32, #tpu.memory_space<vmem>>, %arg4: memref<1x64xf32, #tpu.memory_space<vmem>>, %arg5: memref<1x1xf32, #tpu.memory_space<vmem>>, %arg6: memref<16x1xf32, #tpu.memory_space<vmem>>) attributes {dimension_semantics = [], scalar_prefetch = 0 : i64, scratch_operands = 0 : i64, tpu.core_type = #tpu.core_type<tc>} {
    %c0 = arith.constant 0 : index
    %c0_0 = arith.constant 0 : index
    %0 = vector.load %arg0[%c0, %c0_0] : memref<16x128xf32, #tpu.memory_space<vmem>>, vector<16x128xf32>
    %c0_1 = arith.constant 0 : index
    %c0_2 = arith.constant 0 : index
    %1 = vector.load %arg1[%c0_1, %c0_2] : memref<16x1xf32, #tpu.memory_space<vmem>>, vector<16x1xf32>
    %2 = vector.broadcast %1 : vector<16x1xf32> to vector<16x128xf32>
    %3 = arith.mulf %0, %2 : vector<16x128xf32>
    %cst = arith.constant -1.000000e+02 : f32
    %cst_3 = arith.constant 1.000000e+02 : f32
    %4 = vector.broadcast %cst : f32 to vector<16x128xf32>
    %5 = arith.maximumf %4, %3 : vector<16x128xf32>
    %6 = vector.broadcast %cst_3 : f32 to vector<16x128xf32>
    %7 = arith.minimumf %6, %5 : vector<16x128xf32>
    %c0_4 = arith.constant 0 : index
    %c0_5 = arith.constant 0 : index
    %8 = vector.load %arg2[%c0_4, %c0_5] : memref<128x64xf32, #tpu.memory_space<vmem>>, vector<128x64xf32>
    %cst_6 = arith.constant dense<0.000000e+00> : vector<16x64xf32>
    %9 = tpu.matmul %7, %8, %cst_6 {dimension_numbers = #tpu.dot_dimension_numbers<[1], [0], [0], [1], [0, 0, 1, 1], [], []>} : vector<16x128xf32>, vector<128x64xf32>, vector<16x64xf32> -> vector<16x64xf32>
    %c0_7 = arith.constant 0 : index
    %c0_8 = arith.constant 0 : index
    %10 = vector.load %arg3[%c0_7, %c0_8] : memref<1x64xf32, #tpu.memory_space<vmem>>, vector<1x64xf32>
    %11 = vector.broadcast %10 : vector<1x64xf32> to vector<16x64xf32>
    %12 = arith.addf %9, %11 : vector<16x64xf32>
    %cst_9 = arith.constant 5.000000e-01 : f32
    %13 = vector.broadcast %cst_9 : f32 to vector<16x64xf32>
    %14 = arith.mulf %13, %12 : vector<16x64xf32>
    %cst_10 = arith.constant 0.707106769 : f32
    %15 = vector.broadcast %cst_10 : f32 to vector<16x64xf32>
    %16 = arith.mulf %12, %15 : vector<16x64xf32>
    %17 = math.absf %16 : vector<16x64xf32>
    %cst_11 = arith.constant 0.327591091 : f32
    %18 = vector.broadcast %cst_11 : f32 to vector<16x64xf32>
    %19 = arith.mulf %18, %17 : vector<16x64xf32>
    %cst_12 = arith.constant 1.000000e+00 : f32
    %20 = vector.broadcast %cst_12 : f32 to vector<16x64xf32>
    %21 = arith.addf %20, %19 : vector<16x64xf32>
    %cst_13 = arith.constant 1.000000e+00 : f32
    %22 = vector.broadcast %cst_13 : f32 to vector<16x64xf32>
    %23 = arith.divf %22, %21 : vector<16x64xf32>
    %cst_14 = arith.constant 1.06140542 : f32
    %24 = vector.broadcast %cst_14 : f32 to vector<16x64xf32>
    %25 = arith.mulf %24, %23 : vector<16x64xf32>
    %cst_15 = arith.constant -1.45315206 : f32
    %26 = vector.broadcast %cst_15 : f32 to vector<16x64xf32>
    %27 = arith.addf %25, %26 : vector<16x64xf32>
    %28 = arith.mulf %27, %23 : vector<16x64xf32>
    %cst_16 = arith.constant 1.42141378 : f32
    %29 = vector.broadcast %cst_16 : f32 to vector<16x64xf32>
    %30 = arith.addf %28, %29 : vector<16x64xf32>
    %31 = arith.mulf %30, %23 : vector<16x64xf32>
    %cst_17 = arith.constant -0.284496725 : f32
    %32 = vector.broadcast %cst_17 : f32 to vector<16x64xf32>
    %33 = arith.addf %31, %32 : vector<16x64xf32>
    %34 = arith.mulf %33, %23 : vector<16x64xf32>
    %cst_18 = arith.constant 0.254829586 : f32
    %35 = vector.broadcast %cst_18 : f32 to vector<16x64xf32>
    %36 = arith.addf %34, %35 : vector<16x64xf32>
    %37 = arith.mulf %36, %23 : vector<16x64xf32>
    %cst_19 = arith.constant 0.000000e+00 : f32
    %38 = vector.broadcast %cst_19 : f32 to vector<16x64xf32>
    %39 = arith.subf %38, %17 : vector<16x64xf32>
    %40 = arith.mulf %39, %17 : vector<16x64xf32>
    %41 = math.exp %40 : vector<16x64xf32>
    %42 = arith.mulf %37, %41 : vector<16x64xf32>
    %cst_20 = arith.constant 1.000000e+00 : f32
    %43 = vector.broadcast %cst_20 : f32 to vector<16x64xf32>
    %44 = arith.subf %43, %42 : vector<16x64xf32>
    %cst_21 = arith.constant 0.000000e+00 : f32
    %45 = vector.broadcast %cst_21 : f32 to vector<16x64xf32>
    %46 = arith.cmpf oge, %16, %45 : vector<16x64xf32>
    %cst_22 = arith.constant 0.000000e+00 : f32
    %47 = vector.broadcast %cst_22 : f32 to vector<16x64xf32>
    %48 = arith.subf %47, %44 : vector<16x64xf32>
    %49 = arith.select %46, %44, %48 : vector<16x64xi1>, vector<16x64xf32>
    %cst_23 = arith.constant 1.000000e+00 : f32
    %50 = vector.broadcast %cst_23 : f32 to vector<16x64xf32>
    %51 = arith.addf %50, %49 : vector<16x64xf32>
    %52 = arith.mulf %14, %51 : vector<16x64xf32>
    %c0_24 = arith.constant 0 : index
    %c0_25 = arith.constant 0 : index
    %53 = vector.load %arg4[%c0_24, %c0_25] : memref<1x64xf32, #tpu.memory_space<vmem>>, vector<1x64xf32>
    %54 = vector.broadcast %53 : vector<1x64xf32> to vector<16x64xf32>
    %55 = arith.mulf %52, %54 : vector<16x64xf32>
    %cst_26 = arith.constant dense<0.000000e+00> : vector<16xf32>
    %56 = vector.multi_reduction <add>, %55, %cst_26 [1] : vector<16x64xf32> to vector<16xf32>
    %57 = vector.shape_cast %56 : vector<16xf32> to vector<16x1xf32>
    %c0_27 = arith.constant 0 : index
    %c0_28 = arith.constant 0 : index
    %58 = vector.load %arg5[%c0_27, %c0_28] : memref<1x1xf32, #tpu.memory_space<vmem>>, vector<1x1xf32>
    %59 = vector.broadcast %58 : vector<1x1xf32> to vector<16x1xf32>
    %60 = arith.addf %57, %59 : vector<16x1xf32>
    %61 = arith.negf %60 : vector<16x1xf32>
    %62 = math.exp %61 : vector<16x1xf32>
    %cst_29 = arith.constant 1.000000e+00 : f32
    %63 = vector.broadcast %cst_29 : f32 to vector<16x1xf32>
    %64 = arith.addf %63, %62 : vector<16x1xf32>
    %65 = arith.divf %63, %64 : vector<16x1xf32>
    %c0_30 = arith.constant 0 : index
    %c0_31 = arith.constant 0 : index
    %66 = vector.load %arg6[%c0_30, %c0_31] : memref<16x1xf32, #tpu.memory_space<vmem>>, vector<16x1xf32>
    tpu.vector_store %arg6[%c0_30, %c0_31], %65 {strides = array<i32>} : memref<16x1xf32, #tpu.memory_space<vmem>>, vector<16x1xf32>,
    return
  }
}

</mosaic_0001>

<bundles_post_ra>
// kernel: _forward.3
= control target key start
LH: loop header
LB: loop body
LE: loop exit
PB: predicated region body
PF: predicated region fallthrough
CT: control target
= control target key end

     0   :  { %v273_v0 = vmov 0   ;;  %vm174_vm9 = vcmask 523264   ;;  %vm225_vm13 = vcmask 7168   ;;  %s402_s1 = inlined_call_operand.vmem [shape: f32[16,1], index: 1, kind: input, shape index: {}]   ;;  %s403_s2 = inlined_call_operand.vmem [shape: f32[128,64], index: 2, kind: input, shape index: {}]   ;;  %s404_s3 = inlined_call_operand.vmem [shape: f32[1,64], index: 3, kind: input, shape index: {}]   ;;  %s405_s0 = inlined_call_operand.vmem [shape: f32[16,128], index: 0, kind: input, shape index: {}]   ;;  %s406_s4 = inlined_call_operand.vmem [shape: f32[1,64], index: 4, kind: input, shape index: {}]   ;;  %s407_s5 = inlined_call_operand.<no memory space> [shape: f32[1,1], index: 5, kind: input, shape index: {}]   ;;  %s408_s6 = inlined_call_operand.vmem [shape: f32[16,1], index: 6, kind: output, shape index: {}]  }
   0x1   :  { %253 = vset.pattern.permute.xlu0 %v273_v0  ;;  %v27_v1 = vld [vmem:[%s402_s1] sm:$0xff]  ;;  %v60_v2 = vld [vmem:[%s403_s2 + $0x78] sm:$0xff]  ;;  %v59_v3 = vld [vmem:[%s403_s2 + $0x70] sm:$0xff] }
   0x2   :  { %31 = vperm.xlu0 %253, %v27_v1   ;;  %65 = vmatpush.msra.mxu0 %v60_v2  ;;  %v58_v4 = vld [vmem:[%s403_s2 + $0x68] sm:$0xff]  ;;  %v57_v5 = vld [vmem:[%s403_s2 + $0x60] sm:$0xff]  ;;  %v56_v7 = vld [vmem:[%s403_s2 + $0x58] sm:$0xff] }
   0x3   :  { %236 = vmatpush.msra.mxu1 %v60_v2  ;;  %v28_v6 = vld [vmem:[%s402_s1 + $0x8] sm:$0xff]  ;;  %v55_v8 = vld [vmem:[%s403_s2 + $0x50] sm:$0xff]  ;;  %v53_v10 = vld [vmem:[%s403_s2 + $0x40] sm:$0xff] }
   0x4   :  { %66 = vmatpush.msra.mxu0 %v59_v3  ;;  %v54_v9 = vld [vmem:[%s403_s2 + $0x48] sm:$0xff]  ;;  %v52_v11 = vld [vmem:[%s403_s2 + $0x38] sm:$0xff]  ;;  %v51_v12 = vld [vmem:[%s403_s2 + $0x30] sm:$0xff] }
   0x5   :  { %237 = vmatpush.msra.mxu1 %v59_v3  ;;  %v50_v13 = vld [vmem:[%s403_s2 + $0x28] sm:$0xff]  ;;  %v49_v14 = vld [vmem:[%s403_s2 + $0x20] sm:$0xff]  ;;  %v48_v15 = vld [vmem:[%s403_s2 + $0x18] sm:$0xff] }
   0x6   :  { %67 = vmatpush.msra.mxu0 %v58_v4  ;;  %v47_v16 = vld [vmem:[%s403_s2 + $0x10] sm:$0xff]  ;;  %v46_v17 = vld [vmem:[%s403_s2 + $0x8] sm:$0xff]  ;;  %v45_v18 = vld [vmem:[%s403_s2] sm:$0xff] }
   0x7   :  { %238 = vmatpush.msra.mxu1 %v58_v4  ;;  %v25_v19 = vld [vmem:[%s405_s0] sm:$0xff]  ;;  %v26_v23 = vld [vmem:[%s405_s0 + $0x8] sm:$0xff] }
   0x8   :  { %68 = vmatpush.msra.mxu0 %v57_v5  ;;  %v254_v27 = vld [vmem:[%s404_s3] ss:$0 sm:$0xff] }
   0x9   :  { %239 = vmatpush.msra.mxu1 %v57_v5 }
   0xa   :  { %36 = vperm.xlu0 %253, %v28_v6   ;;  %69 = vmatpush.msra.mxu0 %v56_v7  ;;  %v11_v6 = vstv %s407_s5 }
   0xb   :  { %240 = vmatpush.msra.mxu1 %v56_v7  ;;  %12 = vst [vmem:[#allocation2] sm:$0x1] %v11_v6 }
   0xc   :  { %70 = vmatpush.msra.mxu0 %v55_v8 }
   0xd   :  { %241 = vmatpush.msra.mxu1 %v55_v8 }
   0xe   :  { %71 = vmatpush.msra.mxu0 %v54_v9 }
   0xf   :  { %242 = vmatpush.msra.mxu1 %v54_v9 }
  0x10   :  { %72 = vmatpush.msra.mxu0 %v53_v10 }
  0x11   :  { %243 = vmatpush.msra.mxu1 %v53_v10 }
  0x12   :  { %73 = vmatpush.msra.mxu0 %v52_v11 }
  0x13   :  { %244 = vmatpush.msra.mxu1 %v52_v11 }
  0x14   :  { %74 = vmatpush.msra.mxu0 %v51_v12 }
  0x15   :  { %245 = vmatpush.msra.mxu1 %v51_v12 }
  0x16   :  { %75 = vmatpush.msra.mxu0 %v50_v13 }
  0x17   :  { %246 = vmatpush.msra.mxu1 %v50_v13 }
  0x18   :  { %76 = vmatpush.msra.mxu0 %v49_v14 }
  0x19   :  { %247 = vmatpush.msra.mxu1 %v49_v14 }
  0x1a   :  { %77 = vmatpush.msra.mxu0 %v48_v15 }
  0x1b   :  { %248 = vmatpush.msra.mxu1 %v48_v15 }
  0x1c   :  { %78 = vmatpush.msra.mxu0 %v47_v16 }
  0x1d   :  { %249 = vmatpush.msra.mxu1 %v47_v16 }
  0x1e   :  { %79 = vmatpush.msra.mxu0 %v46_v17 }
  0x1f   :  { %250 = vmatpush.msra.mxu1 %v46_v17 }
  0x20   :  { %80 = vmatpush.msra.mxu0 %v45_v18 }
  0x21   :  { %251 = vmatpush.msra.mxu1 %v45_v18 }
  0x74   :  { %v32_v20 = vpop.permute.xlu0 %31 }
  0x75   :  { %v39_v21 = vmul.f32 %v32_v20, %v25_v19 }
  0x77   :  { %v232_v22 = vclamps-f32 %v39_v21, 100.0 }
  0x79   :  { %81 = vmatmul.f32.vlgmr.msra.gmra.mxu0 %v232_v22 }
  0x7c   :  { %v37_v24 = vpop.permute.xlu0 %36 }
  0x7d   :  { %v40_v25 = vmul.f32 %v37_v24, %v26_v23 }
  0x7f   :  { %v233_v26 = vclamps-f32 %v40_v25, 100.0 }
  0x81   :  { %84 = vmatmul.f32.vlgmr.msra.gmra.mxu1 %v233_v26 }
  0xf6   :  { %v82_v28 = vpop.f32.mrf.mxu0 }
  0xf7   :  { %v372_v29 = vadd.f32 %v254_v27, %v82_v28 }
  0xf9   :  { %v375_v30 = vmul.f32 0.70710677, %v372_v29  ;;  %v88_v25 = vmul.f32 0.5, %v372_v29 }
  0xfb   :  { %v92_v31 = vand.u32 2147483647, %v375_v30  ;;  %vm158_vm8 = vcmp.ge.f32.partialorder %v375_v30, 0.0 }
  0xfd   :  { %v94_v32 = vmul.f32 0.3275911, %v92_v31  ;;  %v146_v50 = vsub.f32 0.0, %v92_v31 }
  0xfe   :  { %v85_v33 = vpop.f32.mrf.mxu1 }
  0xff   :  { %v96_v34 = vadd.f32 1.0, %v94_v32  ;;  %v378_v35 = vadd.f32 %v254_v27, %v85_v33  ;;  %v148_v57 = vmul.f32 %v146_v50, %v92_v31  ;;  %v255_v27 = vld [vmem:[%s406_s4] ss:$0 sm:$0xff] }
 0x101   :  { %257 = vrcp.f32 %v96_v34  ;;  %v381_v36 = vmul.f32 0.70710677, %v378_v35  ;;  %v109_v43 = vand.u32 2147483648, %v96_v34  ;;  %v107_v45 = vand.u32 2147483647, %v96_v34 }
 0x102   :  { %vm103_vm1 = vweird.f32 %v96_v34  ;;  %v150_v0 = vmul.f32 1.442695, %v148_v57  ;;  %v89_v29 = vmul.f32 0.5, %v378_v35 }
 0x103   :  { %v93_v37 = vand.u32 2147483647, %v381_v36  ;;  %v110_v47 = vor.u32 1.1754944e-38, %v109_v43  ;;  %vm108_vm3 = vcmp.eq.f32.partialorder %v107_v45, 8.507059e+37  ;;  %vm159_vm10 = vcmp.ge.f32.partialorder %v381_v36, 0.0 }
 0x105   :  { %v95_v38 = vmul.f32 0.3275911, %v93_v37  ;;  %v147_v2 = vsub.f32 0.0, %v93_v37 }
 0x107   :  { %v258_v39 = vpop.eup %257  ;;  %v97_v41 = vadd.f32 1.0, %v95_v38  ;;  %v149_v9 = vmul.f32 %v147_v2, %v93_v37 }
 0x108   :  { %v99_v40 = vmul.f32 %v258_v39, %v96_v34  ;;  %vm104_vm0 = vweird.f32 %v258_v39 }
 0x109   :  { %259 = vrcp.f32 %v97_v41  ;;  %vm105_vm2 = vmor %vm103_vm1, %vm104_vm0  ;;  %v124_v55 = vand.u32 2147483648, %v97_v41  ;;  %v122_v59 = vand.u32 2147483647, %v97_v41  ;;  %vm118_vm5 = vweird.f32 %v97_v41 }
 0x10a   :  { %v100_v42 = vsub.f32 1.0, %v99_v40  ;;  %261 = vpow2.f32 %v150_v0  ;;  %v152_v14 = vmul.f32 1.442695, %v149_v9 }
 0x10b   :  { %v125_v62 = vor.u32 1.1754944e-38, %v124_v55  ;;  %vm123_vm7 = vcmp.eq.f32.partialorder %v122_v59, 8.507059e+37 }
 0x10c   :  { %v101_v44 = vmul.f32 %v258_v39, %v100_v42  ;;  %263 = vpow2.f32 %v152_v14 }
 0x10e   :  { %v102_v46 = vadd.f32 %v258_v39, %v101_v44  ;;  %v256_v44 = vld [vmem:[#allocation2] ss:$0 sm:$0xff] }
 0x10f   :  { %v260_v48 = vpop.eup %259 }
 0x110   :  { %v106_v49 = vsel %vm105_vm2, %v258_v39, %v102_v46  ;;  %v114_v51 = vmul.f32 %v260_v48, %v97_v41  ;;  %vm119_vm4 = vweird.f32 %v260_v48  ;;  %v262_v16 = vpop.eup %261 }
 0x111   :  { %v111_v52 = vsel %vm108_vm3, %v110_v47, %v106_v49  ;;  %vm120_vm6 = vmor %vm118_vm5, %vm119_vm4 }
 0x112   :  { %v128_v53 = vmul.f32 1.0614054, %v111_v52  ;;  %v115_v54 = vsub.f32 1.0, %v114_v51  ;;  %v264_v31 = vpop.eup %263 }
 0x114   :  { %v130_v56 = vadd.f32 -1.4531521, %v128_v53  ;;  %v116_v58 = vmul.f32 %v260_v48, %v115_v54 }
 0x116   :  { %v132_v60 = vmul.f32 %v130_v56, %v111_v52  ;;  %v117_v61 = vadd.f32 %v260_v48, %v116_v58 }
 0x118   :  { %v134_v63 = vadd.f32 1.4214138, %v132_v60  ;;  %v121_v1 = vsel %vm120_vm6, %v260_v48, %v117_v61 }
 0x119   :  { %v126_v4 = vsel %vm123_vm7, %v125_v62, %v121_v1 }
 0x11a   :  { %v136_v3 = vmul.f32 %v134_v63, %v111_v52  ;;  %v129_v5 = vmul.f32 1.0614054, %v126_v4 }
 0x11c   :  { %v138_v7 = vadd.f32 -0.28449672, %v136_v3  ;;  %v131_v8 = vadd.f32 -1.4531521, %v129_v5 }
 0x11e   :  { %v140_v10 = vmul.f32 %v138_v7, %v111_v52  ;;  %v133_v11 = vmul.f32 %v131_v8, %v126_v4 }
 0x120   :  { %v142_v12 = vadd.f32 0.2548296, %v140_v10  ;;  %v135_v13 = vadd.f32 1.4214138, %v133_v11 }
 0x122   :  { %v144_v15 = vmul.f32 %v142_v12, %v111_v52  ;;  %v137_v17 = vmul.f32 %v135_v13, %v126_v4 }
 0x124   :  { %v154_v18 = vmul.f32 %v262_v16, %v144_v15  ;;  %v139_v19 = vadd.f32 -0.28449672, %v137_v17 }
 0x126   :  { %v156_v20 = vsub.f32 1.0, %v154_v18  ;;  %v141_v21 = vmul.f32 %v139_v19, %v126_v4 }
 0x128   :  { %v160_v22 = vsub.f32 0.0, %v156_v20  ;;  %v143_v23 = vadd.f32 0.2548296, %v141_v21 }
 0x12a   :  { %v162_v24 = vsel %vm158_vm8, %v156_v20, %v160_v22  ;;  %v145_v28 = vmul.f32 %v143_v23, %v126_v4 }
 0x12b   :  { %v164_v26 = vadd.f32 1.0, %v162_v24 }
 0x12c   :  { %v155_v33 = vmul.f32 %v264_v31, %v145_v28 }
 0x12d   :  { %v166_v32 = vmul.f32 %v164_v26, %v88_v25 }
 0x12e   :  { %v157_v37 = vsub.f32 1.0, %v155_v33 }
 0x12f   :  { %v172_v34 = vmul.f32 %v255_v27, %v166_v32 }
 0x130   :  { %v161_v39 = vsub.f32 0.0, %v157_v37 }
 0x131   :  { %v175_v38 = vsel %vm174_vm9, %v172_v34, 0.0 }
 0x132   :  { %176 = vadd.xlane.f32.xlu1 %v175_v38  ;;  %v163_v30 = vsel %vm159_vm10, %v157_v37, %v161_v39 }
 0x133   :  { %v165_v40 = vadd.f32 1.0, %v163_v30 }
 0x135   :  { %v167_v41 = vmul.f32 %v165_v40, %v89_v29 }
 0x137   :  { %v173_v42 = vmul.f32 %v255_v27, %v167_v41 }
 0x139   :  { %v178_v43 = vsel %vm174_vm9, %v173_v42, 0.0 }
 0x13a   :  { %179 = vadd.xlane.f32.xlu1 %v178_v43 }
 0x1a5   :  { %v177_v45 = vpop.xlane.xlu1 %176 }
 0x1a6   :  { %v185_v46 = vadd.f32 %v256_v44, %v177_v45 }
 0x1a8   :  { %v234_v47 = vmul.f32 -1.442695, %v185_v46 }
 0x1aa   :  { %265 = vpow2.f32 %v234_v47 }
 0x1ad   :  { %v180_v48 = vpop.xlane.xlu1 %179 }
 0x1ae   :  { %v186_v49 = vadd.f32 %v256_v44, %v180_v48 }
 0x1b0   :  { %v266_v50 = vpop.eup %265  ;;  %v235_v52 = vmul.f32 -1.442695, %v186_v49 }
 0x1b1   :  { %v193_v51 = vadd.f32 1.0, %v266_v50 }
 0x1b3   :  { %267 = vrcp.f32 %v193_v51  ;;  %v206_v56 = vand.u32 2147483648, %v193_v51  ;;  %v204_v58 = vand.u32 2147483647, %v193_v51  ;;  %vm200_vm12 = vweird.f32 %v193_v51 }
 0x1b4   :  { %269 = vpow2.f32 %v235_v52 }
 0x1b5   :  { %v207_v60 = vor.u32 1.1754944e-38, %v206_v56  ;;  %vm205_vm15 = vcmp.eq.f32.partialorder %v204_v58, 8.507059e+37 }
 0x1b9   :  { %v268_v36 = vpop.eup %267 }
 0x1ba   :  { %v270_v53 = vpop.eup %269  ;;  %v196_v35 = vmul.f32 %v268_v36, %v193_v51  ;;  %vm201_vm11 = vweird.f32 %v268_v36 }
 0x1bb   :  { %v194_v54 = vadd.f32 1.0, %v270_v53  ;;  %vm202_vm14 = vmor %vm200_vm12, %vm201_vm11 }
 0x1bc   :  { %v197_v55 = vsub.f32 1.0, %v196_v35 }
 0x1bd   :  { %271 = vrcp.f32 %v194_v54  ;;  %v221_v2 = vand.u32 2147483648, %v194_v54  ;;  %v219_v4 = vand.u32 2147483647, %v194_v54  ;;  %vm215_vm1 = vweird.f32 %v194_v54 }
 0x1be   :  { %v198_v57 = vmul.f32 %v268_v36, %v197_v55 }
 0x1bf   :  { %v222_v6 = vor.u32 1.1754944e-38, %v221_v2  ;;  %vm220_vm3 = vcmp.eq.f32.partialorder %v219_v4, 8.507059e+37 }
 0x1c0   :  { %v199_v59 = vadd.f32 %v268_v36, %v198_v57 }
 0x1c2   :  { %v203_v61 = vsel %vm202_vm14, %v268_v36, %v199_v59 }
 0x1c3   :  { %v272_v62 = vpop.eup %271  ;;  %v208_v63 = vsel %vm205_vm15, %v207_v60, %v203_v61 }
 0x1c4   :  { %226 = vst.msk [vmem:[%s408_s6] sm:$0xff] %vm225_vm13, %v208_v63  ;;  %v211_v0 = vmul.f32 %v272_v62, %v194_v54  ;;  %vm216_vm0 = vweird.f32 %v272_v62 }
 0x1c5   :  { %vm217_vm2 = vmor %vm215_vm1, %vm216_vm0 }
 0x1c6   :  { %v212_v1 = vsub.f32 1.0, %v211_v0 }
 0x1c8   :  { %v213_v3 = vmul.f32 %v272_v62, %v212_v1 }
 0x1ca   :  { %v214_v5 = vadd.f32 %v272_v62, %v213_v3 }
 0x1cc   :  { %v218_v7 = vsel %vm217_vm2, %v272_v62, %v214_v5 }
 0x1cd   :  { %v223_v8 = vsel %vm220_vm3, %v222_v6, %v218_v7 }
 0x1ce   :  { %227 = vst.msk [vmem:[%s408_s6 + $0x8] sm:$0xff] %vm225_vm13, %v223_v8 }

// kernel: _forward.2
= control target key start
LH: loop header
LB: loop body
LE: loop exit
PB: predicated region body
PF: predicated region fallthrough
CT: control target
= control target key end

     0   :  { %7 = vsyncpa [#allocation3], 0  ;;  %s2599_s0 = inlined_call_operand.hbm [shape: bf16[16,256,128], index: 0, kind: input, shape index: {}]   ;;  %s2600_s1 = inlined_call_operand.vmem [shape: bf16[16,1,256], index: 1, kind: input, shape index: {}]   ;;  %s2601_s2 = inlined_call_operand.vmem [shape: f32[16,1,128], index: 2, kind: output, shape index: {}]  }
   0x1   :  { %9 = vsyncpa [#allocation3 + $0x1], 0  ;;  %s2339_s9 = smov 0   ;;  %s2341_s10 = smov 0  }
   0x2   :  { %s2343_s11 = smov 0   ;;  %s2345_s12 = smov 0  }
   0x3 LB: > { %s1558_s13 = sadd.s32 4294967295, %s2320_s12   ;;  %s2359_s14 = sadd.s32 1, %s2320_s12   ;;  %s2320_s12 = sphi %s2345_s12, %s2608_s12   ;;  %s2316_s11 = sphi %s2343_s11, %s2607_s11   ;;  %s2312_s10 = sphi %s2341_s10, %s2606_s10   ;;  %s2308_s9 = sphi %s2339_s9, %s2605_s9  }
   0x4   : > { %s19_s15 = ssub.s32 %s2320_s12, %s2359_s14  ;;  %s22_s16 = sadd.s32 1, %s2316_s11 }
   0x5   : > { %p20_p0 = scmp.eq.s32.totalorder %s19_s15, 0  ;;  %p29_p1 = scmp.ne.s32.totalorder %s2316_s11, %s2312_s10 }
   0x6   : > { %p30_p2 = scmp.eq.s32.totalorder %s2320_s12, 0  ;;  %p35_p3 = scmp.ne.s32.totalorder %s2312_s10, %s2308_s9 }
   0x7   : > { %s2369_s17 = scalar_select %p20_p0, %s2316_s11, %s22_s16  }
   0x8   : > { %p2371_p4 = por %p30_p2, %p29_p1  ;;  %p36_p5 = scmp.eq.s32.totalorder %s1558_s13, 0 }
   0x9   : > { %p2221_p6 = scmp.lt.s32.totalorder %s2320_s12, 2  ;;  %s111_s20 = sand.u32 1, %s2316_s11  }
   0xa   : > { %p2378_p7 = por %p36_p5, %p35_p3  ;;  %s1562_s21 = sshll.u32 %s111_s20, 10 }
   0xb   : > { %s2086_s22 = sshll.u32 %s2320_s12, 10  ;;  %s115_s26 = scalar_lea.vmem [#allocation2], %s1562_s21 }
   0xc   : > { %s121_s25 = scalar_lea.hbm %s2599_s0, %s2086_s22  ;;  %s124_s27 = sshll.u32 %s115_s26, 4  ;;  %s125_s27 = int_to_ptr.vmem [resolvable:$true] %s124_s27 }
   0xd   : > { %s122_s28 = sshll.u32 %s121_s25, 4  ;;  %p2389_p8 = pnand %p2221_p6, %p2371_p4  ;;  %s123_s28 = int_to_ptr.hbm [resolvable:$true] %s122_s28 }
   0xe   : > { %p1566_p9 = scmp.ge.s32.totalorder %s2320_s12, 1  ;;  %s112_s30 = scalar_lea.sflag [#allocation3], %s111_s20 }
   0xf   : > { %s2256_s3 = sshra.s32 %s123_s28, 4  ;;  %p2260_p11 = pneg %p2389_p8  ;;  %s2257_s3 = int_to_ptr.hbm [resolvable:$true] %s2256_s3 }
  0x10   : > { %s2258_s4 = scalar_lea.hbm %s2257_s3, 1024  ;;  %s2263_s7 = scalar_lea.hbm %s2599_s0, 2048 }
  0x11   : > { %p2259_p10 = scmp.ne.s32.totalorder %s2257_s3, %s2258_s4  ;;  %p2264_p0 = scmp.lt.s32.totalorder %s2257_s3, %s2599_s0 }
  0x12   : > { %p2265_p1 = scmp.lt.s32.totalorder %s2263_s7, %s2258_s4 }
  0x13   : > { %p2261_p12 = pnand %p2260_p11, %p2259_p10 }
  0x14   : > { %p2266_p2 = por %p2265_p1, %p2264_p0 }
  0x15   : > { %p2262_p13 = pneg %p2261_p12 }
  0x17   : > { %p2267_p3 = pnand %p2266_p2, %p2262_p13 }
  0x19   : > { %2270 = shalt.err (!%p2267_p3)
}
  0x1a   : > { %s2322_s15 = smov 64   ;;  %s2323_s16 = smov 4  }
  0x1b   : > { %2220 = dma.hbm_to_vmem [thread:$0]  (!%p2389_p8), %s123_s28, 16384, %s125_s27, %s112_s30, %s2322_s15, %s2322_s15, %s2323_s16  }
  0x1c   : > { %p141_p4 = scmp.lt.s32.totalorder %s2320_s12, 3 }
  0x1e   : > { %p142_p5 = pnand %p1566_p9, %p141_p4 }
  0x1f   : > { %s147_s18 = sand.u32 (!%p142_p5), 1, %s2312_s10  }
  0x20   : > { %145 = sbr.rel (%p142_p5) target bundleno = 309 (0x135), region = 28  ;;  %s1567_s20 = sshll.u32 (!%p142_p5), %s147_s18, 10 }
  0x21   : > { %s148_s21 = scalar_lea.sflag (!%p142_p5), [#allocation3], %s147_s18  ;;  %s2408_s22 = scalar_lea.vmem (!%p142_p5), [#allocation2], %s1567_s20 }
  0x25   : > { %2303 = dma.done.wait (%p2378_p7), %s148_s21, 16384  }
  0x26   : > { %2305 = vsyncadd (%p2378_p7), %s148_s21, 4294950912  ;;  %v2094_v0 = vld [vmem:[%s2408_s22 + $0x38] sm:$0xff]  ;;  %s1568_s23 = sshll.u32 %s1558_s13, 3  ;;  %v2093_v4 = vld [vmem:[%s2408_s22 + $0x30] sm:$0xff] }
  0x27   : > { %v2102_v1 = vld [vmem:[%s2408_s22 + $0x78] sm:$0xff]  ;;  %555 = vmatpush.bf16.msra.mxu0 %v2094_v0  ;;  %v2101_v5 = vld [vmem:[%s2408_s22 + $0x70] sm:$0xff]  ;;  %p179_p6 = scmp.lt.s32.totalorder %s1568_s23, 15  ;;  %v2092_v8 = vld [vmem:[%s2408_s22 + $0x28] sm:$0xff] }
  0x28   : > { %v2110_v2 = vld [vmem:[%s2408_s22 + $0xb8] sm:$0xff]  ;;  %568 = vmatpush.bf16.msra.mxu1 %v2102_v1  ;;  %v2109_v6 = vld [vmem:[%s2408_s22 + $0xb0] sm:$0xff]  ;;  %v2100_v9 = vld [vmem:[%s2408_s22 + $0x68] sm:$0xff] }
  0x29   : > { %v2118_v3 = vld [vmem:[%s2408_s22 + $0xf8] sm:$0xff]  ;;  %683 = vmatpush.bf16.msra.mxu2 %v2110_v2  ;;  %v2117_v7 = vld [vmem:[%s2408_s22 + $0xf0] sm:$0xff]  ;;  %v2108_v10 = vld [vmem:[%s2408_s22 + $0xa8] sm:$0xff]  ;;  %s2610_s23 = smov (!%p179_p6, %s1568_s23), 15 }
  0x2a   : > { %696 = vmatpush.bf16.msra.mxu3 %v2118_v3  ;;  %v2116_v11 = vld [vmem:[%s2408_s22 + $0xe8] sm:$0xff]  ;;  %v2091_v12 = vld [vmem:[%s2408_s22 + $0x20] sm:$0xff]  ;;  %s1569_s12 = sshll.u32 %s2610_s23, 1  ;;  %v2090_v16 = vld [vmem:[%s2408_s22 + $0x18] sm:$0xff]  ;;  %s2576_s27 = scalar_lea.vmem %s2601_s2, %s2610_s23 }
  0x2b   : > { %556 = vmatpush.bf16.msra.mxu0 %v2093_v4  ;;  %v2099_v13 = vld [vmem:[%s2408_s22 + $0x60] sm:$0xff]  ;;  %v2098_v17 = vld [vmem:[%s2408_s22 + $0x58] sm:$0xff]  ;;  %s2440_s24 = scalar_lea.vmem %s2600_s1, %s1569_s12  ;;  %v2089_v21 = vld [vmem:[%s2408_s22 + $0x10] sm:$0xff] }
  0x2c   : > { %569 = vmatpush.bf16.msra.mxu1 %v2101_v5  ;;  %v2107_v14 = vld [vmem:[%s2408_s22 + $0xa0] sm:$0xff]  ;;  %v2106_v18 = vld [vmem:[%s2408_s22 + $0x98] sm:$0xff]  ;;  %v2097_v22 = vld [vmem:[%s2408_s22 + $0x50] sm:$0xff] }
  0x2d   : > { %684 = vmatpush.bf16.msra.mxu2 %v2109_v6  ;;  %v2115_v15 = vld [vmem:[%s2408_s22 + $0xe0] sm:$0xff]  ;;  %v2114_v19 = vld [vmem:[%s2408_s22 + $0xd8] sm:$0xff]  ;;  %v2105_v23 = vld [vmem:[%s2408_s22 + $0x90] sm:$0xff] }
  0x2e   : > { %697 = vmatpush.bf16.msra.mxu3 %v2117_v7  ;;  %v189_v20 = vld [vmem:[%s2440_s24] sm:$0x3]  ;;  %v2113_v24 = vld [vmem:[%s2408_s22 + $0xd0] sm:$0xff]  ;;  %v2088_v25 = vld [vmem:[%s2408_s22 + $0x8] sm:$0xff] }
  0x2f   : > { %557 = vmatpush.bf16.msra.mxu0 %v2092_v8  ;;  %454 = vst [vmem:[#allocation1] ss:$9 sm:$0xff] %v189_v20  ;;  %v2096_v26 = vld [vmem:[%s2408_s22 + $0x48] sm:$0xff]  ;;  %v190_v29 = vld [vmem:[%s2440_s24 + $0x2] sm:$0x3]  ;;  %v2087_v32 = vld [vmem:[%s2408_s22] sm:$0xff] }
  0x30   : > { %570 = vmatpush.bf16.msra.mxu1 %v2100_v9  ;;  %v2104_v27 = vld [vmem:[%s2408_s22 + $0x88] sm:$0xff]  ;;  %v2095_v33 = vld [vmem:[%s2408_s22 + $0x40] sm:$0xff]  ;;  %v2126_v36 = vld [vmem:[%s2408_s22 + $0x138] sm:$0xff] }
  0x31   : > { %685 = vmatpush.bf16.msra.mxu2 %v2108_v10  ;;  %v2112_v28 = vld [vmem:[%s2408_s22 + $0xc8] sm:$0xff]  ;;  %v2103_v34 = vld [vmem:[%s2408_s22 + $0x80] sm:$0xff]  ;;  %v2134_v37 = vld [vmem:[%s2408_s22 + $0x178] sm:$0xff] }
  0x32   : > { %698 = vmatpush.bf16.msra.mxu3 %v2116_v11  ;;  %v2111_v35 = vld [vmem:[%s2408_s22 + $0xc0] sm:$0xff]  ;;  %v2142_v38 = vld [vmem:[%s2408_s22 + $0x1b8] sm:$0xff]  ;;  %v2125_v41 = vld [vmem:[%s2408_s22 + $0x130] sm:$0xff] }
  0x33   : > { %558 = vmatpush.bf16.msra.mxu0 %v2091_v12  ;;  %v2150_v39 = vld [vmem:[%s2408_s22 + $0x1f8] sm:$0xff]  ;;  %v2133_v42 = vld [vmem:[%s2408_s22 + $0x170] sm:$0xff]  ;;  %v2124_v47 = vld [vmem:[%s2408_s22 + $0x128] sm:$0xff] }
  0x34   : > { %571 = vmatpush.bf16.msra.mxu1 %v2099_v13  ;;  %v191_v40 = vld [vmem:[%s2440_s24 + $0x4] sm:$0x3]  ;;  %v2141_v43 = vld [vmem:[%s2408_s22 + $0x1b0] sm:$0xff]  ;;  %v2132_v48 = vld [vmem:[%s2408_s22 + $0x168] sm:$0xff] }
  0x35   : > { %686 = vmatpush.bf16.msra.mxu2 %v2107_v14  ;;  %v2149_v44 = vld [vmem:[%s2408_s22 + $0x1f0] sm:$0xff]  ;;  %v2140_v49 = vld [vmem:[%s2408_s22 + $0x1a8] sm:$0xff]  ;;  %v192_v51 = vld [vmem:[%s2440_s24 + $0x6] sm:$0x3] }
  0x36   : > { %699 = vmatpush.bf16.msra.mxu3 %v2115_v15  ;;  %v455_v30 = vld [vmem:[#allocation1] sm:$0xff]  ;;  %v456_v31 = vld [vmem:[#allocation1 + $0x9] sm:$0xff]  ;;  %v2121_v63 = vld [vmem:[%s2408_s22 + $0x110] sm:$0xff] }
  0x37   : > { %559 = vmatpush.bf16.msra.mxu0 %v2090_v16  ;;  %582 = vst [vmem:[#allocation1] ss:$9 sm:$0xff] %v190_v29  ;;  %v2148_v50 = vld [vmem:[%s2408_s22 + $0x1e8] sm:$0xff]  ;;  %v2123_v52 = vld [vmem:[%s2408_s22 + $0x120] sm:$0xff]  ;;  %v2122_v58 = vld [vmem:[%s2408_s22 + $0x118] sm:$0xff] }
  0x38   : > { %572 = vmatpush.bf16.msra.mxu1 %v2098_v17  ;;  %v2131_v53 = vld [vmem:[%s2408_s22 + $0x160] sm:$0xff]  ;;  %v2130_v59 = vld [vmem:[%s2408_s22 + $0x158] sm:$0xff]  ;;  %v2129_v0 = vld [vmem:[%s2408_s22 + $0x150] sm:$0xff] }
  0x39   : > { %687 = vmatpush.bf16.msra.mxu2 %v2106_v18  ;;  %v2139_v54 = vld [vmem:[%s2408_s22 + $0x1a0] sm:$0xff]  ;;  %v2138_v60 = vld [vmem:[%s2408_s22 + $0x198] sm:$0xff]  ;;  %v2137_v1 = vld [vmem:[%s2408_s22 + $0x190] sm:$0xff] }
  0x3a   : > { %700 = vmatpush.bf16.msra.mxu3 %v2114_v19  ;;  %v2147_v55 = vld [vmem:[%s2408_s22 + $0x1e0] sm:$0xff]  ;;  %v2146_v61 = vld [vmem:[%s2408_s22 + $0x1d8] sm:$0xff]  ;;  %v2145_v2 = vld [vmem:[%s2408_s22 + $0x1d0] sm:$0xff] }
  0x3b   : > { %560 = vmatpush.bf16.msra.mxu0 %v2089_v21  ;;  %v193_v62 = vld [vmem:[%s2440_s24 + $0x8] sm:$0x3]  ;;  %v2120_v5 = vld [vmem:[%s2408_s22 + $0x108] sm:$0xff]  ;;  %v2158_v13 = vld [vmem:[%s2408_s22 + $0x238] sm:$0xff] }
  0x3c   : > { %573 = vmatpush.bf16.msra.mxu1 %v2097_v22  ;;  %v2128_v6 = vld [vmem:[%s2408_s22 + $0x148] sm:$0xff]  ;;  %v2119_v9 = vld [vmem:[%s2408_s22 + $0x100] sm:$0xff]  ;;  %v2166_v14 = vld [vmem:[%s2408_s22 + $0x278] sm:$0xff] }
  0x3d   : > { %688 = vmatpush.bf16.msra.mxu2 %v2105_v23  ;;  %v2136_v7 = vld [vmem:[%s2408_s22 + $0x188] sm:$0xff]  ;;  %v2127_v10 = vld [vmem:[%s2408_s22 + $0x140] sm:$0xff]  ;;  %v2174_v17 = vld [vmem:[%s2408_s22 + $0x2b8] sm:$0xff] }
  0x3e   : > { %701 = vmatpush.bf16.msra.mxu3 %v2113_v24  ;;  %v583_v45 = vld [vmem:[#allocation1] sm:$0xff]  ;;  %v584_v46 = vld [vmem:[#allocation1 + $0x9] sm:$0xff]  ;;  %v2157_v20 = vld [vmem:[%s2408_s22 + $0x230] sm:$0xff] }
  0x3f   : > { %561 = vmatpush.bf16.msra.mxu0 %v2088_v25  ;;  %710 = vst [vmem:[#allocation1] ss:$9 sm:$0xff] %v191_v40  ;;  %v2144_v8 = vld [vmem:[%s2408_s22 + $0x1c8] sm:$0xff]  ;;  %v2135_v11 = vld [vmem:[%s2408_s22 + $0x180] sm:$0xff]  ;;  %v2182_v18 = vld [vmem:[%s2408_s22 + $0x2f8] sm:$0xff] }
  0x40   : > { %574 = vmatpush.bf16.msra.mxu1 %v2096_v26  ;;  %v2143_v12 = vld [vmem:[%s2408_s22 + $0x1c0] sm:$0xff]  ;;  %v2165_v21 = vld [vmem:[%s2408_s22 + $0x270] sm:$0xff]  ;;  %v2156_v25 = vld [vmem:[%s2408_s22 + $0x228] sm:$0xff] }
  0x41   : > { %689 = vmatpush.bf16.msra.mxu2 %v2104_v27  ;;  %v194_v19 = vld [vmem:[%s2440_s24 + $0xa] sm:$0x3]  ;;  %v2173_v22 = vld [vmem:[%s2408_s22 + $0x2b0] sm:$0xff]  ;;  %v195_v24 = vld [vmem:[%s2440_s24 + $0xc] sm:$0x3] }
  0x42   : > { %702 = vmatpush.bf16.msra.mxu3 %v2112_v28  ;;  %v2181_v23 = vld [vmem:[%s2408_s22 + $0x2f0] sm:$0xff]  ;;  %v2164_v26 = vld [vmem:[%s2408_s22 + $0x268] sm:$0xff] }
  0x43   : > { %562 = vmatpush.bf16.msra.mxu0 %v2087_v32  ;;  %v2172_v27 = vld [vmem:[%s2408_s22 + $0x2a8] sm:$0xff]  ;;  %v2163_v32 = vld [vmem:[%s2408_s22 + $0x260] sm:$0xff]  ;;  %v2161_v40 = vld [vmem:[%s2408_s22 + $0x250] sm:$0xff] }
  0x44   : > { %575 = vmatpush.bf16.msra.mxu1 %v2095_v33  ;;  %v2180_v28 = vld [vmem:[%s2408_s22 + $0x2e8] sm:$0xff]  ;;  %v2171_v33 = vld [vmem:[%s2408_s22 + $0x2a0] sm:$0xff] }
  0x45   : > { %690 = vmatpush.bf16.msra.mxu2 %v2103_v34  ;;  %v2179_v34 = vld [vmem:[%s2408_s22 + $0x2e0] sm:$0xff] }
  0x46   : > { %703 = vmatpush.bf16.msra.mxu3 %v2111_v35  ;;  %563 = vmatmul.bf16.vlgmr.msra.gmra.mxu0 %v455_v30  ;;  %v711_v56 = vld [vmem:[#allocation1] sm:$0xff]  ;;  %v712_v57 = vld [vmem:[#allocation1 + $0x9] sm:$0xff] }
  0x47   : > { %811 = vmatpush.bf16.msrb.mxu0 %v2126_v36  ;;  %576 = vmatmul.bf16.vlgmr.msra.gmra.mxu1 %v456_v31  ;;  %838 = vst [vmem:[#allocation1] ss:$9 sm:$0xff] %v192_v51  ;;  %v2155_v31 = vld [vmem:[%s2408_s22 + $0x220] sm:$0xff]  ;;  %v2154_v35 = vld [vmem:[%s2408_s22 + $0x218] sm:$0xff] }
  0x48   : > { %824 = vmatpush.bf16.msrb.mxu1 %v2134_v37  ;;  %691 = vmatmul.bf16.vlgmr.msra.gmra.mxu2 %v583_v45  ;;  %v2162_v36 = vld [vmem:[%s2408_s22 + $0x258] sm:$0xff]  ;;  %v2160_v45 = vld [vmem:[%s2408_s22 + $0x248] sm:$0xff]  ;;  %v2159_v51 = vld [vmem:[%s2408_s22 + $0x240] sm:$0xff] }
  0x49   : > { %939 = vmatpush.bf16.msrb.mxu2 %v2142_v38  ;;  %704 = vmatmul.bf16.vlgmr.msra.gmra.mxu3 %v584_v46  ;;  %v2170_v37 = vld [vmem:[%s2408_s22 + $0x298] sm:$0xff]  ;;  %v2168_v46 = vld [vmem:[%s2408_s22 + $0x288] sm:$0xff] }
  0x4a   : > { %952 = vmatpush.bf16.msrb.mxu3 %v2150_v39  ;;  %v2178_v38 = vld [vmem:[%s2408_s22 + $0x2d8] sm:$0xff]  ;;  %v2153_v39 = vld [vmem:[%s2408_s22 + $0x210] sm:$0xff] }
  0x4b   : > { %812 = vmatpush.bf16.msrb.mxu0 %v2125_v41  ;;  %v2169_v41 = vld [vmem:[%s2408_s22 + $0x290] sm:$0xff] }
  0x4c   : > { %825 = vmatpush.bf16.msrb.mxu1 %v2133_v42  ;;  %v2177_v42 = vld [vmem:[%s2408_s22 + $0x2d0] sm:$0xff] }
  0x4d   : > { %940 = vmatpush.bf16.msrb.mxu2 %v2141_v43  ;;  %v196_v43 = vld [vmem:[%s2440_s24 + $0xe] sm:$0x3] }
  0x4e   : > { %953 = vmatpush.bf16.msrb.mxu3 %v2149_v44  ;;  %v839_v3 = vld [vmem:[#allocation1] sm:$0xff]  ;;  %v840_v4 = vld [vmem:[#allocation1 + $0x9] sm:$0xff] }
  0x4f   : > { %813 = vmatpush.bf16.msrb.mxu0 %v2124_v47  ;;  %966 = vst [vmem:[#allocation1] ss:$9 sm:$0xff] %v193_v62  ;;  %v2152_v44 = vld [vmem:[%s2408_s22 + $0x208] sm:$0xff] }
  0x50   : > { %826 = vmatpush.bf16.msrb.mxu1 %v2132_v48  ;;  %v2176_v47 = vld [vmem:[%s2408_s22 + $0x2c8] sm:$0xff] }
  0x51   : > { %941 = vmatpush.bf16.msrb.mxu2 %v2140_v49  ;;  %v2188_v62 = vld [vmem:[%s2408_s22 + $0x328] sm:$0xff] }
  0x52   : > { %954 = vmatpush.bf16.msrb.mxu3 %v2148_v50  ;;  %v2151_v50 = vld [vmem:[%s2408_s22 + $0x200] sm:$0xff] }
  0x53   : > { %814 = vmatpush.bf16.msrb.mxu0 %v2123_v52  ;;  %v2167_v52 = vld [vmem:[%s2408_s22 + $0x280] sm:$0xff] }
  0x54   : > { %827 = vmatpush.bf16.msrb.mxu1 %v2131_v53  ;;  %v2175_v53 = vld [vmem:[%s2408_s22 + $0x2c0] sm:$0xff] }
  0x55   : > { %942 = vmatpush.bf16.msrb.mxu2 %v2139_v54  ;;  %v2190_v54 = vld [vmem:[%s2408_s22 + $0x338] sm:$0xff] }
  0x56   : > { %955 = vmatpush.bf16.msrb.mxu3 %v2147_v55  ;;  %v2495_v15 = vld [vmem:[#allocation1] sm:$0xff]  ;;  %v2497_v16 = vld [vmem:[#allocation1 + $0x9] sm:$0xff] }
  0x57   : > { %815 = vmatpush.bf16.msrb.mxu0 %v2122_v58  ;;  %1094 = vst [vmem:[#allocation1] ss:$9 sm:$0xff] %v194_v19  ;;  %v2198_v55 = vld [vmem:[%s2408_s22 + $0x378] sm:$0xff]  ;;  %v2189_v58 = vld [vmem:[%s2408_s22 + $0x330] sm:$0xff]  ;;  %v2191_v19 = vld [vmem:[%s2408_s22 + $0x340] sm:$0xff] }
  0x58   : > { %828 = vmatpush.bf16.msrb.mxu1 %v2130_v59  ;;  %v2197_v59 = vld [vmem:[%s2408_s22 + $0x370] sm:$0xff] }
  0x59   : > { %943 = vmatpush.bf16.msrb.mxu2 %v2138_v60  ;;  %v2205_v60 = vld [vmem:[%s2408_s22 + $0x3b0] sm:$0xff] }
  0x5a   : > { %956 = vmatpush.bf16.msrb.mxu3 %v2146_v61  ;;  %v2213_v61 = vld [vmem:[%s2408_s22 + $0x3f0] sm:$0xff] }
  0x5b   : > { %816 = vmatpush.bf16.msrb.mxu0 %v2121_v63  ;;  %v2196_v63 = vld [vmem:[%s2408_s22 + $0x368] sm:$0xff] }
  0x5c   : > { %829 = vmatpush.bf16.msrb.mxu1 %v2129_v0  ;;  %v2204_v0 = vld [vmem:[%s2408_s22 + $0x3a8] sm:$0xff] }
  0x5d   : > { %944 = vmatpush.bf16.msrb.mxu2 %v2137_v1  ;;  %v2212_v1 = vld [vmem:[%s2408_s22 + $0x3e8] sm:$0xff] }
  0x5e   : > { %957 = vmatpush.bf16.msrb.mxu3 %v2145_v2  ;;  %v1095_v29 = vld [vmem:[#allocation1] sm:$0xff]  ;;  %v1096_v30 = vld [vmem:[#allocation1 + $0x9] sm:$0xff] }
  0x5f   : > { %817 = vmatpush.bf16.msrb.mxu0 %v2120_v5  ;;  %1222 = vst [vmem:[#allocation1] ss:$9 sm:$0xff] %v195_v24  ;;  %v2187_v2 = vld [vmem:[%s2408_s22 + $0x320] sm:$0xff] }
  0x60   : > { %830 = vmatpush.bf16.msrb.mxu1 %v2128_v6  ;;  %v2211_v5 = vld [vmem:[%s2408_s22 + $0x3e0] sm:$0xff]  ;;  %v2186_v6 = vld [vmem:[%s2408_s22 + $0x318] sm:$0xff] }
  0x61   : > { %945 = vmatpush.bf16.msrb.mxu2 %v2136_v7  ;;  %v2194_v7 = vld [vmem:[%s2408_s22 + $0x358] sm:$0xff] }
  0x62   : > { %958 = vmatpush.bf16.msrb.mxu3 %v2144_v8  ;;  %v2202_v8 = vld [vmem:[%s2408_s22 + $0x398] sm:$0xff] }
  0x63   : > { %818 = vmatpush.bf16.msrb.mxu0 %v2119_v9  ;;  %v2210_v9 = vld [vmem:[%s2408_s22 + $0x3d8] sm:$0xff] }
  0x64   : > { %831 = vmatpush.bf16.msrb.mxu1 %v2127_v10  ;;  %v2185_v10 = vld [vmem:[%s2408_s22 + $0x310] sm:$0xff] }
  0x65   : > { %946 = vmatpush.bf16.msrb.mxu2 %v2135_v11  ;;  %v2193_v11 = vld [vmem:[%s2408_s22 + $0x350] sm:$0xff] }
  0x66   : > { %959 = vmatpush.bf16.msrb.mxu3 %v2143_v12  ;;  %819 = vmatmul.bf16.vlgmr.msrb.gmra.mxu0 %v711_v56  ;;  %v2528_v48 = vld [vmem:[#allocation1] sm:$0xff]  ;;  %v2530_v49 = vld [vmem:[#allocation1 + $0x9] sm:$0xff]  ;;  %v2201_v12 = vld [vmem:[%s2408_s22 + $0x390] sm:$0xff] }
  0x67   : > { %1067 = vmatpush.bf16.msra.mxu0 %v2158_v13  ;;  %832 = vmatmul.bf16.vlgmr.msrb.gmra.mxu1 %v712_v57  ;;  %1350 = vst [vmem:[#allocation1] ss:$9 sm:$0xff] %v196_v43  ;;  %v2206_v56 = vld [vmem:[%s2408_s22 + $0x3b8] sm:$0xff]  ;;  %v2209_v13 = vld [vmem:[%s2408_s22 + $0x3d0] sm:$0xff] }
  0x68   : > { %1080 = vmatpush.bf16.msra.mxu1 %v2166_v14  ;;  %947 = vmatmul.bf16.vlgmr.msrb.gmra.mxu2 %v839_v3  ;;  %v2214_v57 = vld [vmem:[%s2408_s22 + $0x3f8] sm:$0xff]  ;;  %v2195_v3 = vld [vmem:[%s2408_s22 + $0x360] sm:$0xff]  ;;  %v2184_v14 = vld [vmem:[%s2408_s22 + $0x308] sm:$0xff] }
  0x69   : > { %1195 = vmatpush.bf16.msra.mxu2 %v2174_v17  ;;  %960 = vmatmul.bf16.vlgmr.msrb.gmra.mxu3 %v840_v4  ;;  %v2203_v4 = vld [vmem:[%s2408_s22 + $0x3a0] sm:$0xff]  ;;  %v2208_v17 = vld [vmem:[%s2408_s22 + $0x3c8] sm:$0xff] }
  0x6a   : > { %1208 = vmatpush.bf16.msra.mxu3 %v2182_v18  ;;  %v2183_v18 = vld [vmem:[%s2408_s22 + $0x300] sm:$0xff] }
  0x6b   : > { %1068 = vmatpush.bf16.msra.mxu0 %v2157_v20  ;;  %v2199_v20 = vld [vmem:[%s2408_s22 + $0x380] sm:$0xff] }
  0x6c   : > { %1081 = vmatpush.bf16.msra.mxu1 %v2165_v21  ;;  %v2207_v21 = vld [vmem:[%s2408_s22 + $0x3c0] sm:$0xff] }
  0x6d   : > { %1196 = vmatpush.bf16.msra.mxu2 %v2173_v22 }
  0x6e   : > { %1209 = vmatpush.bf16.msra.mxu3 %v2181_v23  ;;  %v1351_v22 = vld [vmem:[#allocation1] sm:$0xff]  ;;  %v1352_v23 = vld [vmem:[#allocation1 + $0x9] sm:$0xff] }
  0x6f   : > { %1069 = vmatpush.bf16.msra.mxu0 %v2156_v25 }
  0x70   : > { %1082 = vmatpush.bf16.msra.mxu1 %v2164_v26 }
  0x71   : > { %1197 = vmatpush.bf16.msra.mxu2 %v2172_v27 }
  0x72   : > { %1210 = vmatpush.bf16.msra.mxu3 %v2180_v28 }
  0x73   : > { %1070 = vmatpush.bf16.msra.mxu0 %v2155_v31 }
  0x74   : > { %1083 = vmatpush.bf16.msra.mxu1 %v2163_v32 }
  0x75   : > { %1198 = vmatpush.bf16.msra.mxu2 %v2171_v33 }
  0x76   : > { %1211 = vmatpush.bf16.msra.mxu3 %v2179_v34 }
  0x77   : > { %1071 = vmatpush.bf16.msra.mxu0 %v2154_v35 }
  0x78   : > { %1084 = vmatpush.bf16.msra.mxu1 %v2162_v36 }
  0x79   : > { %1199 = vmatpush.bf16.msra.mxu2 %v2170_v37 }
  0x7a   : > { %1212 = vmatpush.bf16.msra.mxu3 %v2178_v38 }
  0x7b   : > { %1072 = vmatpush.bf16.msra.mxu0 %v2153_v39 }
  0x7c   : > { %1085 = vmatpush.bf16.msra.mxu1 %v2161_v40 }
  0x7d   : > { %1200 = vmatpush.bf16.msra.mxu2 %v2169_v41 }
  0x7e   : > { %1213 = vmatpush.bf16.msra.mxu3 %v2177_v42 }
  0x7f   : > { %1073 = vmatpush.bf16.msra.mxu0 %v2152_v44 }
  0x80   : > { %1086 = vmatpush.bf16.msra.mxu1 %v2160_v45 }
  0x81   : > { %1201 = vmatpush.bf16.msra.mxu2 %v2168_v46 }
  0x82   : > { %1214 = vmatpush.bf16.msra.mxu3 %v2176_v47 }
  0x83   : > { %1074 = vmatpush.bf16.msra.mxu0 %v2151_v50 }
  0x84   : > { %1087 = vmatpush.bf16.msra.mxu1 %v2159_v51 }
  0x85   : > { %1202 = vmatpush.bf16.msra.mxu2 %v2167_v52 }
  0x86   : > { %1215 = vmatpush.bf16.msra.mxu3 %v2175_v53  ;;  %1075 = vmatmul.bf16.vlgmr.msra.gmra.mxu0 %v2495_v15  ;;  %v2192_v15 = vld [vmem:[%s2408_s22 + $0x348] sm:$0xff] }
  0x87   : > { %1323 = vmatpush.bf16.msrb.mxu0 %v2190_v54  ;;  %1088 = vmatmul.bf16.vlgmr.msra.gmra.mxu1 %v2497_v16  ;;  %v2200_v16 = vld [vmem:[%s2408_s22 + $0x388] sm:$0xff] }
  0x88   : > { %1336 = vmatpush.bf16.msrb.mxu1 %v2198_v55  ;;  %1203 = vmatmul.bf16.vlgmr.msra.gmra.mxu2 %v1095_v29 }
  0x89   : > { %1451 = vmatpush.bf16.msrb.mxu2 %v2206_v56  ;;  %1216 = vmatmul.bf16.vlgmr.msra.gmra.mxu3 %v1096_v30 }
  0x8a   : > { %1464 = vmatpush.bf16.msrb.mxu3 %v2214_v57 }
  0x8b   : > { %1324 = vmatpush.bf16.msrb.mxu0 %v2189_v58 }
  0x8c   : > { %1337 = vmatpush.bf16.msrb.mxu1 %v2197_v59 }
  0x8d   : > { %1452 = vmatpush.bf16.msrb.mxu2 %v2205_v60 }
  0x8e   : > { %1465 = vmatpush.bf16.msrb.mxu3 %v2213_v61 }
  0x8f   : > { %1325 = vmatpush.bf16.msrb.mxu0 %v2188_v62 }
  0x90   : > { %1338 = vmatpush.bf16.msrb.mxu1 %v2196_v63 }
  0x91   : > { %1453 = vmatpush.bf16.msrb.mxu2 %v2204_v0 }
  0x92   : > { %1466 = vmatpush.bf16.msrb.mxu3 %v2212_v1 }
  0x93   : > { %1326 = vmatpush.bf16.msrb.mxu0 %v2187_v2 }
  0x94   : > { %1339 = vmatpush.bf16.msrb.mxu1 %v2195_v3 }
  0x95   : > { %1454 = vmatpush.bf16.msrb.mxu2 %v2203_v4 }
  0x96   : > { %1467 = vmatpush.bf16.msrb.mxu3 %v2211_v5 }
  0x97   : > { %1327 = vmatpush.bf16.msrb.mxu0 %v2186_v6 }
  0x98   : > { %1340 = vmatpush.bf16.msrb.mxu1 %v2194_v7 }
  0x99   : > { %1455 = vmatpush.bf16.msrb.mxu2 %v2202_v8 }
  0x9a   : > { %1468 = vmatpush.bf16.msrb.mxu3 %v2210_v9 }
  0x9b   : > { %1328 = vmatpush.bf16.msrb.mxu0 %v2185_v10 }
  0x9c   : > { %1341 = vmatpush.bf16.msrb.mxu1 %v2193_v11 }
  0x9d   : > { %1456 = vmatpush.bf16.msrb.mxu2 %v2201_v12 }
  0x9e   : > { %1469 = vmatpush.bf16.msrb.mxu3 %v2209_v13 }
  0x9f   : > { %1329 = vmatpush.bf16.msrb.mxu0 %v2184_v14 }
  0xa0   : > { %1342 = vmatpush.bf16.msrb.mxu1 %v2192_v15 }
  0xa1   : > { %1457 = vmatpush.bf16.msrb.mxu2 %v2200_v16 }
  0xa2   : > { %1470 = vmatpush.bf16.msrb.mxu3 %v2208_v17 }
  0xa3   : > { %1330 = vmatpush.bf16.msrb.mxu0 %v2183_v18 }
  0xa4   : > { %1343 = vmatpush.bf16.msrb.mxu1 %v2191_v19 }
  0xa5   : > { %1458 = vmatpush.bf16.msrb.mxu2 %v2199_v20 }
  0xa6   : > { %1471 = vmatpush.bf16.msrb.mxu3 %v2207_v21  ;;  %1331 = vmatmul.bf16.vlgmr.msrb.gmra.mxu0 %v2528_v48 }
  0xa7   : > { %1344 = vmatmul.bf16.vlgmr.msrb.gmra.mxu1 %v2530_v49 }
  0xa8   : > { %1459 = vmatmul.bf16.vlgmr.msrb.gmra.mxu2 %v1351_v22 }
  0xa9   : > { %1472 = vmatmul.bf16.vlgmr.msrb.gmra.mxu3 %v1352_v23 }
  0xc3   : > { %v564_v24 = vpop.f32.mrf.mxu0 }
  0xc4   : > { %v577_v25 = vpop.f32.mrf.mxu1 }
  0xc5   : > { %v578_v26 = vadd.f32 %v577_v25, %v564_v24 }
  0xc7   : > { %1477 = vst [vmem:[%s2576_s27] sm:$0x1] %v578_v26 }
  0xcb   : > { %v692_v27 = vpop.f32.mrf.mxu2  ;;  %v566_v30 = vpop.f32.mrf.mxu0 }
  0xcc   : > { %v705_v28 = vpop.f32.mrf.mxu3  ;;  %v579_v31 = vpop.f32.mrf.mxu1 }
  0xcd   : > { %v706_v29 = vadd.f32 %v705_v28, %v692_v27 }
  0xcf   : > { %1478 = vst [vmem:[%s2576_s27 + $0x1] sm:$0x1] %v706_v29 }
  0xd3   : > { %v694_v32 = vpop.f32.mrf.mxu2 }
  0xd4   : > { %v707_v33 = vpop.f32.mrf.mxu3 }
  0xe3   : > { %v820_v34 = vpop.f32.mrf.mxu0 }
  0xe4   : > { %v833_v35 = vpop.f32.mrf.mxu1 }
  0xe5   : > { %v834_v36 = vadd.f32 %v833_v35, %v820_v34 }
  0xe7   : > { %1479 = vst [vmem:[%s2576_s27 + $0x2] sm:$0x1] %v834_v36 }
  0xeb   : > { %v948_v37 = vpop.f32.mrf.mxu2  ;;  %v822_v40 = vpop.f32.mrf.mxu0 }
  0xec   : > { %v961_v38 = vpop.f32.mrf.mxu3  ;;  %v835_v41 = vpop.f32.mrf.mxu1 }
  0xed   : > { %v962_v39 = vadd.f32 %v961_v38, %v948_v37 }
  0xef   : > { %1480 = vst [vmem:[%s2576_s27 + $0x3] sm:$0x1] %v962_v39 }
  0xf3   : > { %v950_v42 = vpop.f32.mrf.mxu2 }
  0xf4   : > { %v963_v43 = vpop.f32.mrf.mxu3 }
 0x103   : > { %v1076_v44 = vpop.f32.mrf.mxu0 }
 0x104   : > { %v1089_v45 = vpop.f32.mrf.mxu1 }
 0x105   : > { %v1090_v46 = vadd.f32 %v1089_v45, %v1076_v44 }
 0x107   : > { %1481 = vst [vmem:[%s2576_s27 + $0x4] sm:$0x1] %v1090_v46 }
 0x10b   : > { %v1204_v47 = vpop.f32.mrf.mxu2  ;;  %v1078_v50 = vpop.f32.mrf.mxu0 }
 0x10c   : > { %v1217_v48 = vpop.f32.mrf.mxu3  ;;  %v1091_v51 = vpop.f32.mrf.mxu1 }
 0x10d   : > { %v1218_v49 = vadd.f32 %v1217_v48, %v1204_v47 }
 0x10f   : > { %1482 = vst [vmem:[%s2576_s27 + $0x5] sm:$0x1] %v1218_v49 }
 0x113   : > { %v1206_v52 = vpop.f32.mrf.mxu2 }
 0x114   : > { %v1219_v53 = vpop.f32.mrf.mxu3 }
 0x123   : > { %v1332_v54 = vpop.f32.mrf.mxu0 }
 0x124   : > { %v1345_v55 = vpop.f32.mrf.mxu1 }
 0x125   : > { %v1346_v56 = vadd.f32 %v1345_v55, %v1332_v54 }
 0x127   : > { %1483 = vst [vmem:[%s2576_s27 + $0x6] sm:$0x1] %v1346_v56 }
 0x12b   : > { %v1460_v57 = vpop.f32.mrf.mxu2  ;;  %v1334_v60 = vpop.f32.mrf.mxu0 }
 0x12c   : > { %v1473_v58 = vpop.f32.mrf.mxu3  ;;  %v1347_v61 = vpop.f32.mrf.mxu1 }
 0x12d   : > { %v1474_v59 = vadd.f32 %v1473_v58, %v1460_v57 }
 0x12f   : > { %1484 = vst [vmem:[%s2576_s27 + $0x7] sm:$0x1] %v1474_v59 }
 0x133   : > { %v1462_v62 = vpop.f32.mrf.mxu2 }
 0x134   : > { %v1475_v63 = vpop.f32.mrf.mxu3 }
 0x135 PF: > { %p12_p7 = scmp.ge.s32.totalorder %s2359_s14, 4   ;;  %s2605_s9 = smov %s2312_s10 }
 0x136   : > { %s2606_s10 = smov %s2316_s11  ;;  %s2607_s11 = smov %s2369_s17 }
 0x137   : > { %s2608_s12 = smov %s2359_s14  ;;  %14 = sbr.rel (!%p12_p7) target bundleno = 3 (0x3), region = 71 }
 0x13c   :  { %1505 = vsyncpa [#allocation3], 1 }
 0x13d   :  { %1507 = vsyncpa [#allocation3 + $0x1], 1 }

</bundles_post_ra>
